<compile_context>
chip_gen: v7x
topology: tpu7x:2x2x1
jax: 0.10.0
libtpu: 0.0.40
codegen_flags: <defaults>
</compile_context>

<pallas_src>
import jax
import jax.numpy as jnp
from jax.experimental import pallas as pl
from jax.experimental.pallas import tpu as pltpu


# ----------------------------- kernel ---------------------------------------


def predict_kernel(xcat_ref, w1_ref, b1_ref, w2_ref, b2_ref, w3_ref, b3_ref,
                   out_ref):
    # Layer 1: relu([x | external] @ W1' + b1')   (linear encoder folded into W1')
    h1 = jnp.dot(xcat_ref[...], w1_ref[...],
                 preferred_element_type=jnp.float32) + b1_ref[...]
    h1 = jnp.maximum(h1, 0.0)

    # Layer 2: Linear(64 -> 16) + ReLU
    h2 = jnp.dot(h1, w2_ref[...],
                 preferred_element_type=jnp.float32) + b2_ref[...]
    h2 = jnp.maximum(h2, 0.0)

    # Layer 3: Linear(16 -> n_out) — unpadded store (lane-masked vst, ~4x less HBM)
    out = jnp.dot(h2, w3_ref[...],
                  preferred_element_type=jnp.float32) + b3_ref[...]
    out_ref[...] = out.astype(out_ref.dtype)


# --------------------------- host-side prep ---------------------------------


def prepare_params(params):
    """Fold the (linear) encoder into layer 1 and fuse W1. Run once per params."""
    hp = jax.lax.Precision.HIGHEST
    w1x = jnp.dot(params["enc_w"], params["w1a"], precision=hp)          # (d_in, 64)
    b1p = params["b1"] + jnp.dot(params["enc_b"], params["w1a"], precision=hp)
    w1_full = jnp.concatenate([w1x, params["w1b"]], axis=0)              # (d_in+n_ext, 64)
    # TODO(synk): the real injected encoder is an arbitrary nn.Module; this fold
    # is exact only because the stand-in encoder is a single Linear. Drop the
    # fold (and run the encoder in-kernel) if the injected encoder is nonlinear.
    return {
        "w1": w1_full, "b1": b1p,
        "w2": params["w2"], "b2": params["b2"],
        "w3": params["w3"], "b3": params["b3"],
    }


def _round_up(n, m):
    return ((n + m - 1) // m) * m


def _batch_dim_semantics():
    """CORE_PARALLEL on v7x (2 TCs/chip); plain 'parallel' elsewhere."""
    try:
        kind = jax.devices()[0].device_kind.lower()
    except Exception:
        kind = ""
    if "v7" in kind or "tpu7" in kind:
        return (pltpu.CORE_PARALLEL,)
    return ("parallel",)


def predict(x_input, external, prepared, *, tb=4096):
    """Run the Predict forward pass with a batch-tiled Pallas kernel.

    `prepared` must come from prepare_params(params) (hoisted out of the hot
    path so the fold / concat of weights is not re-launched every call).
    """
    B, d_in = x_input.shape
    n_ext = external.shape[1]
    d_cat = d_in + n_ext
    n_out = prepared["w3"].shape[1]

    # One fused input stream: [x | external]  (single DMA pair per grid step).
    xcat = jnp.concatenate([x_input, external], axis=-1)                 # (B, d_cat)

    # Batch tile: multiple of 8 sublanes, as large as allowed (capped by tb).
    cap = max(8, (tb // 8) * 8)
    TB = min(_round_up(B, 8), cap)
    n_blocks = pl.cdiv(B, TB)        # ragged last tile handled by Pallas masking

    flops = 2 * B * (d_cat * 64 + 64 * 16 + 16 * n_out)
    bytes_accessed = 4 * (B * (d_cat + n_out)
                          + sum(int(prepared[k].size)
                                for k in ("w1", "b1", "w2", "b2", "w3", "b3")))

    row_spec = lambda shape: pl.BlockSpec(shape, lambda i: (i, 0))   # batch-tiled
    pin_spec = lambda shape: pl.BlockSpec(shape, lambda i: (0, 0))   # VMEM-resident

    return pl.pallas_call(
        predict_kernel,
        out_shape=jax.ShapeDtypeStruct((B, n_out), jnp.float32),
        grid=(n_blocks,),
        in_specs=[
            row_spec((TB, d_cat)),              # fused [x | external]
            pin_spec(prepared["w1"].shape),     # W1' (encoder folded, fused)
            pin_spec(prepared["b1"].shape),     # b1'
            pin_spec(prepared["w2"].shape),     # W2
            pin_spec(prepared["b2"].shape),     # b2
            pin_spec(prepared["w3"].shape),     # W3 (unpadded: n_out columns)
            pin_spec(prepared["b3"].shape),     # b3
        ],
        out_specs=row_spec((TB, n_out)),        # unpadded output block
        compiler_params=pltpu.CompilerParams(
            dimension_semantics=_batch_dim_semantics(),
        ),
        cost_estimate=pl.CostEstimate(
            flops=flops, transcendentals=0, bytes_accessed=bytes_accessed),
    )(xcat, prepared["w1"], prepared["b1"], prepared["w2"], prepared["b2"],
      prepared["w3"], prepared["b3"])


# ----------------------- params / pure-JAX reference ------------------------


def init_params(key, d_in, n_extracted, n_external, n_output_steps):
    ks = jax.random.split(key, 8)
    scale = 0.1
    return {
        "enc_w": scale * jax.random.normal(ks[0], (d_in, n_extracted), jnp.float32),
        "enc_b": scale * jax.random.normal(ks[1], (1, n_extracted), jnp.float32),
        # full W1 would be (n_extracted + n_external, 64); kept split along its
        # input axis so concat(extracted, external) @ W1 = ext@W1a + extern@W1b.
        "w1a":   scale * jax.random.normal(ks[2], (n_extracted, 64), jnp.float32),
        "w1b":   scale * jax.random.normal(ks[3], (n_external, 64), jnp.float32),
        "b1":    scale * jax.random.normal(ks[4], (1, 64), jnp.float32),
        "w2":    scale * jax.random.normal(ks[5], (64, 16), jnp.float32),
        "b2":    scale * jax.random.normal(ks[6], (1, 16), jnp.float32),
        "w3":    scale * jax.random.normal(ks[7], (16, n_output_steps), jnp.float32),
        "b3":    jnp.zeros((1, n_output_steps), jnp.float32),
    }


def predict_ref(x_input, external, params):
    """Pure-JAX reference of the original (unfolded) forward pass."""
    hp = jax.lax.Precision.HIGHEST
    extracted = jnp.dot(x_input, params["enc_w"], precision=hp) + params["enc_b"]
    x_concat = jnp.concatenate([extracted, external], axis=-1)
    w1 = jnp.concatenate([params["w1a"], params["w1b"]], axis=0)
    h1 = jnp.maximum(jnp.dot(x_concat, w1, precision=hp) + params["b1"], 0.0)
    h2 = jnp.maximum(jnp.dot(h1, params["w2"], precision=hp) + params["b2"], 0.0)
    return jnp.dot(h2, params["w3"], precision=hp) + params["b3"]


# --------------------------------- demo --------------------------------------


if __name__ == "__main__":
    # Small, module-consistent shapes.
    D_IN = 32                # raw input feature dim fed to the encoder
    N_EXTRACTED = 16         # n_extracted_features
    N_EXTERNAL = 8           # n_external_features
    N_OUTPUT_STEPS = 4       # n_output_steps
    # p (dropout prob) is irrelevant at inference; Dropout acts as identity.

    key = jax.random.PRNGKey(0)
    k_x, k_e, k_p = jax.random.split(key, 3)
    params = init_params(k_p, D_IN, N_EXTRACTED, N_EXTERNAL, N_OUTPUT_STEPS)
    prepared = prepare_params(params)     # hoisted: computed once per param set

    # Case 1: single exact block (B == TB).
    B1 = 8
    x1 = jax.random.normal(k_x, (B1, D_IN), jnp.float32)
    e1 = jax.random.normal(k_e, (B1, N_EXTERNAL), jnp.float32)
    out1 = jax.block_until_ready(predict(x1, e1, prepared))
    ref1 = predict_ref(x1, e1, params)
    assert out1.shape == (B1, N_OUTPUT_STEPS)
    assert jnp.allclose(out1, ref1, atol=1e-3, rtol=1e-3)

    # Case 2: multi-block grid (3 exact tiles of 8 rows).
    B2 = 24
    x2 = jax.random.normal(jax.random.fold_in(k_x, 1), (B2, D_IN), jnp.float32)
    e2 = jax.random.normal(jax.random.fold_in(k_e, 1), (B2, N_EXTERNAL), jnp.float32)
    out2 = jax.block_until_ready(predict(x2, e2, prepared, tb=8))
    ref2 = predict_ref(x2, e2, params)
    assert out2.shape == (B2, N_OUTPUT_STEPS)
    assert jnp.allclose(out2, ref2, atol=1e-3, rtol=1e-3)

    # Case 3: ragged last tile (B=20, TB=8 -> 3 tiles, last one partial);
    # no host-side pad/slice — OOB rows are masked on the output store.
    B3 = 20
    x3 = jax.random.normal(jax.random.fold_in(k_x, 2), (B3, D_IN), jnp.float32)
    e3 = jax.random.normal(jax.random.fold_in(k_e, 2), (B3, N_EXTERNAL), jnp.float32)
    out3 = jax.block_until_ready(predict(x3, e3, prepared, tb=8))
    ref3 = predict_ref(x3, e3, params)
    assert out3.shape == (B3, N_OUTPUT_STEPS)
    assert jnp.allclose(out3, ref3, atol=1e-3, rtol=1e-3)

    print("KERNEL_OK")
</pallas_src>

<mosaic_0001>
module attributes {stable_mosaic.version = 11 : i64} {
  func.func @predict_kernel(%arg0: i32, %arg1: memref<8x40xf32, #tpu.memory_space<vmem>>, %arg2: memref<40x64xf32, #tpu.memory_space<vmem>>, %arg3: memref<1x64xf32, #tpu.memory_space<vmem>>, %arg4: memref<64x16xf32, #tpu.memory_space<vmem>>, %arg5: memref<1x16xf32, #tpu.memory_space<vmem>>, %arg6: memref<16x4xf32, #tpu.memory_space<vmem>>, %arg7: memref<1x4xf32, #tpu.memory_space<vmem>>, %arg8: memref<8x4xf32, #tpu.memory_space<vmem>>) attributes {dimension_semantics = [#tpu.dimension_semantics<parallel>], iteration_bounds = array<i64: 1>, scalar_prefetch = 0 : i64, scratch_operands = 0 : i64, tpu.core_type = #tpu.core_type<tc>, window_params = [{transform_indices = @transform_0, window_bounds = array<i64: 8, 40>}, {pipeline_mode = #tpu.pipeline_mode<synchronous>, transform_indices = @transform_1, window_bounds = array<i64: 40, 64>}, {pipeline_mode = #tpu.pipeline_mode<synchronous>, transform_indices = @transform_2, window_bounds = array<i64: 1, 64>}, {pipeline_mode = #tpu.pipeline_mode<synchronous>, transform_indices = @transform_3, window_bounds = array<i64: 64, 16>}, {pipeline_mode = #tpu.pipeline_mode<synchronous>, transform_indices = @transform_4, window_bounds = array<i64: 1, 16>}, {pipeline_mode = #tpu.pipeline_mode<synchronous>, transform_indices = @transform_5, window_bounds = array<i64: 16, 4>}, {pipeline_mode = #tpu.pipeline_mode<synchronous>, transform_indices = @transform_6, window_bounds = array<i64: 1, 4>}, {transform_indices = @transform_7, window_bounds = array<i64: 8, 4>}]} {
    %c0 = arith.constant 0 : index
    %c0_0 = arith.constant 0 : index
    %0 = vector.load %arg1[%c0, %c0_0] : memref<8x40xf32, #tpu.memory_space<vmem>>, vector<8x40xf32>
    %c0_1 = arith.constant 0 : index
    %c0_2 = arith.constant 0 : index
    %1 = vector.load %arg2[%c0_1, %c0_2] : memref<40x64xf32, #tpu.memory_space<vmem>>, vector<40x64xf32>
    %cst = arith.constant dense<0.000000e+00> : vector<8x64xf32>
    %2 = tpu.matmul %0, %1, %cst {dimension_numbers = #tpu.dot_dimension_numbers<[1], [0], [0], [1], [0, 0, 1, 1], [], []>} : vector<8x40xf32>, vector<40x64xf32>, vector<8x64xf32> -> vector<8x64xf32>
    %c0_3 = arith.constant 0 : index
    %c0_4 = arith.constant 0 : index
    %3 = vector.load %arg3[%c0_3, %c0_4] : memref<1x64xf32, #tpu.memory_space<vmem>>, vector<1x64xf32>
    %4 = vector.broadcast %3 : vector<1x64xf32> to vector<8x64xf32>
    %5 = arith.addf %2, %4 : vector<8x64xf32>
    %cst_5 = arith.constant 0.000000e+00 : f32
    %6 = vector.broadcast %cst_5 : f32 to vector<8x64xf32>
    %7 = arith.maximumf %5, %6 : vector<8x64xf32>
    %c0_6 = arith.constant 0 : index
    %c0_7 = arith.constant 0 : index
    %8 = vector.load %arg4[%c0_6, %c0_7] : memref<64x16xf32, #tpu.memory_space<vmem>>, vector<64x16xf32>
    %cst_8 = arith.constant dense<0.000000e+00> : vector<8x16xf32>
    %9 = tpu.matmul %7, %8, %cst_8 {dimension_numbers = #tpu.dot_dimension_numbers<[1], [0], [0], [1], [0, 0, 1, 1], [], []>} : vector<8x64xf32>, vector<64x16xf32>, vector<8x16xf32> -> vector<8x16xf32>
    %c0_9 = arith.constant 0 : index
    %c0_10 = arith.constant 0 : index
    %10 = vector.load %arg5[%c0_9, %c0_10] : memref<1x16xf32, #tpu.memory_space<vmem>>, vector<1x16xf32>
    %11 = vector.broadcast %10 : vector<1x16xf32> to vector<8x16xf32>
    %12 = arith.addf %9, %11 : vector<8x16xf32>
    %cst_11 = arith.constant 0.000000e+00 : f32
    %13 = vector.broadcast %cst_11 : f32 to vector<8x16xf32>
    %14 = arith.maximumf %12, %13 : vector<8x16xf32>
    %c0_12 = arith.constant 0 : index
    %c0_13 = arith.constant 0 : index
    %15 = vector.load %arg6[%c0_12, %c0_13] : memref<16x4xf32, #tpu.memory_space<vmem>>, vector<16x4xf32>
    %cst_14 = arith.constant dense<0.000000e+00> : vector<8x4xf32>
    %16 = tpu.matmul %14, %15, %cst_14 {dimension_numbers = #tpu.dot_dimension_numbers<[1], [0], [0], [1], [0, 0, 1, 1], [], []>} : vector<8x16xf32>, vector<16x4xf32>, vector<8x4xf32> -> vector<8x4xf32>
    %c0_15 = arith.constant 0 : index
    %c0_16 = arith.constant 0 : index
    %17 = vector.load %arg7[%c0_15, %c0_16] : memref<1x4xf32, #tpu.memory_space<vmem>>, vector<1x4xf32>
    %18 = vector.broadcast %17 : vector<1x4xf32> to vector<8x4xf32>
    %19 = arith.addf %16, %18 : vector<8x4xf32>
    %c0_17 = arith.constant 0 : index
    %c0_18 = arith.constant 0 : index
    %20 = vector.load %arg8[%c0_17, %c0_18] : memref<8x4xf32, #tpu.memory_space<vmem>>, vector<8x4xf32>
    tpu.vector_store %arg8[%c0_17, %c0_18], %19 {strides = array<i32>} : memref<8x4xf32, #tpu.memory_space<vmem>>, vector<8x4xf32>,
    return
  }
  func.func @transform_0(%arg0: i32) -> (i32, i32) {
    %c0_i32 = arith.constant 0 : i32
    %c0_i32_0 = arith.constant 0 : i32
    return %arg0, %c0_i32 : i32, i32
  }
  func.func @transform_1(%arg0: i32) -> (i32, i32) {
    %c0_i32 = arith.constant 0 : i32
    %c0_i32_0 = arith.constant 0 : i32
    %c0_i32_1 = arith.constant 0 : i32
    return %c0_i32, %c0_i32_0 : i32, i32
  }
  func.func @transform_2(%arg0: i32) -> (i32, i32) {
    %c0_i32 = arith.constant 0 : i32
    %c0_i32_0 = arith.constant 0 : i32
    %c0_i32_1 = arith.constant 0 : i32
    return %c0_i32, %c0_i32_0 : i32, i32
  }
  func.func @transform_3(%arg0: i32) -> (i32, i32) {
    %c0_i32 = arith.constant 0 : i32
    %c0_i32_0 = arith.constant 0 : i32
    %c0_i32_1 = arith.constant 0 : i32
    return %c0_i32, %c0_i32_0 : i32, i32
  }
  func.func @transform_4(%arg0: i32) -> (i32, i32) {
    %c0_i32 = arith.constant 0 : i32
    %c0_i32_0 = arith.constant 0 : i32
    %c0_i32_1 = arith.constant 0 : i32
    return %c0_i32, %c0_i32_0 : i32, i32
  }
  func.func @transform_5(%arg0: i32) -> (i32, i32) {
    %c0_i32 = arith.constant 0 : i32
    %c0_i32_0 = arith.constant 0 : i32
    %c0_i32_1 = arith.constant 0 : i32
    return %c0_i32, %c0_i32_0 : i32, i32
  }
  func.func @transform_6(%arg0: i32) -> (i32, i32) {
    %c0_i32 = arith.constant 0 : i32
    %c0_i32_0 = arith.constant 0 : i32
    %c0_i32_1 = arith.constant 0 : i32
    return %c0_i32, %c0_i32_0 : i32, i32
  }
  func.func @transform_7(%arg0: i32) -> (i32, i32) {
    %c0_i32 = arith.constant 0 : i32
    %c0_i32_0 = arith.constant 0 : i32
    return %arg0, %c0_i32 : i32, i32
  }
}

</mosaic_0001>

<bundles_post_ra>
// kernel: tpu_custom_call.1
= control target key start
LH: loop header
LB: loop body
LE: loop exit
PB: predicated region body
PF: predicated region fallthrough
CT: control target
= control target key end

     0   :  { %v380_v0 = vmov 0.0|0.0   ;;  %vm381_vm0 = vmmov 0   ;;  %v382_v4 = vmov 0.0   ;;  %vm39_vm1 = vcmask 326656   ;;  %s486_s1 = inlined_call_operand.vmem [shape: f32[40,64], index: 1, kind: input, shape index: {}]   ;;  %s487_s3 = inlined_call_operand.vmem [shape: f32[64,16], index: 3, kind: input, shape index: {}]   ;;  %s488_s0 = inlined_call_operand.vmem [shape: f32[8,40], index: 0, kind: input, shape index: {}]   ;;  %s489_s2 = inlined_call_operand.vmem [shape: f32[1,64], index: 2, kind: input, shape index: {}]   ;;  %s490_s5 = inlined_call_operand.vmem [shape: f32[16,4], index: 5, kind: input, shape index: {}]   ;;  %s491_s4 = inlined_call_operand.vmem [shape: f32[1,16], index: 4, kind: input, shape index: {}]   ;;  %s492_s6 = inlined_call_operand.vmem [shape: f32[1,4], index: 6, kind: input, shape index: {}]   ;;  %s493_s7 = inlined_call_operand.vmem [shape: f32[8,4], index: 7, kind: output, shape index: {}]  }
   0x1   :  { %356 = vmatprep.subr.bf16.mxu0 %v380_v0  ;;  %v27_v1 = vld [vmem:[%s486_s1] sm:$0xff]  ;;  %v28_v2 = vld [vmem:[%s486_s1 + $0x8] sm:$0xff]  ;;  %v29_v3 = vld [vmem:[%s486_s1 + $0x10] sm:$0xff]  ;;  %327 = vmatprep.mubr.msk.f32.mxu0 %vm381_vm0, %v382_v4  ;;  %vm129_vm2 = vcmask 523264   ;;  %vm213_vm3 = vcmask 130048   ;;  %vm287_vm4 = vcmask 31744  }
   0x2   :  { %v357_v5 = vpack.c.bf16 %v28_v2, %v27_v1  ;;  %v30_v6 = vld [vmem:[%s486_s1 + $0x18] sm:$0xff]  ;;  %362 = vmatprep.subr.bf16.mxu1 %v380_v0  ;;  %346 = vmatprep.mubr.msk.f32.mxu1 %vm381_vm0, %v382_v4  ;;  %v114_v7 = vld [vmem:[%s487_s3] sm:$0xff]  ;;  %v115_v8 = vld [vmem:[%s487_s3 + $0x8] sm:$0xff] }
   0x3   :  { %v116_v9 = vld [vmem:[%s487_s3 + $0x10] sm:$0xff]  ;;  %v360_v10 = vpack.c.bf16 %v30_v6, %v29_v3  ;;  %v363_v11 = vpack.c.bf16 %v115_v8, %v114_v7  ;;  %v117_v12 = vld [vmem:[%s487_s3 + $0x18] sm:$0xff]  ;;  %v118_v14 = vld [vmem:[%s487_s3 + $0x20] sm:$0xff] }
   0x4   :  { %358 = vmatpush3.bf16.msra.mxu0 %v357_v5  ;;  %v366_v13 = vpack.c.bf16 %v117_v12, %v116_v9  ;;  %v119_v15 = vld [vmem:[%s487_s3 + $0x28] sm:$0xff]  ;;  %v31_v16 = vld [vmem:[%s486_s1 + $0x20] sm:$0xff]  ;;  %v120_v19 = vld [vmem:[%s487_s3 + $0x30] sm:$0xff] }
   0x5   :  { %359 = vmatprep.subr.bf16.mxu0 %v380_v0  ;;  %364 = vmatpush3.bf16.msra.mxu1 %v363_v11  ;;  %v26_v17 = vld [vmem:[%s488_s0] sm:$0xff]  ;;  %v369_v18 = vpack.c.bf16 %v119_v15, %v118_v14  ;;  %v121_v20 = vld [vmem:[%s487_s3 + $0x38] sm:$0xff]  ;;  %v205_v28 = vld [vmem:[%s490_s5 + $0x8] sm:$0xff] }
   0x6   :  { %365 = vmatprep.subr.bf16.mxu1 %v380_v0  ;;  %v372_v21 = vpack.c.bf16 %v121_v20, %v120_v19  ;;  %v293_v22 = vld [vmem:[%s489_s2] ss:$0 sm:$0xff] }
   0x7   :  { %v204_v27 = vld [vmem:[%s490_s5] sm:$0xff] }
   0x8   :  { %361 = vmatpush3.bf16.msra.mxu0 %v360_v10  ;;  %v375_v29 = vpack.c.bf16 %v205_v28, %v204_v27  ;;  %v295_v30 = vld [vmem:[%s491_s4] ss:$0 sm:$0xff] }
   0x9   :  { %325 = vmatprep.subr.mxu0 %v382_v4  ;;  %367 = vmatpush3.bf16.msra.mxu1 %v366_v13  ;;  %v297_v35 = vld [vmem:[%s492_s6] ss:$0 sm:$0xff] }
   0xa   :  { %368 = vmatprep.subr.bf16.mxu1 %v380_v0 }
   0xc   :  { %326 = vmatpush3.msra.mxu0 %v31_v16 }
   0xd   :  { %328 = vmatmul.mubr.msk.f32.vlgmr.msra.gmra.mrb[0].mxu0 %vm39_vm1, %v26_v17  ;;  %374 = vmatprep.subr.bf16.mxu0 %v380_v0 }
   0xe   :  { %370 = vmatpush3.bf16.msra.mxu1 %v369_v18  ;;  %353 = vmatprep.mubr.msk.f32.mxu0 %vm381_vm0, %v382_v4 }
   0xf   :  { %371 = vmatprep.subr.bf16.mxu1 %v380_v0  ;;  %376 = vmatpush3.bf16.msra.mxu0 %v375_v29 }
  0x12   :  { %373 = vmatpush3.bf16.msra.mxu1 %v372_v21 }
  0xe0   :  { %v109_v23 = vpop.f32.mrb[0].mxu0 }
  0xe1   :  { %v110_v24 = vadd.f32 %v293_v22, %v109_v23  ;;  %v329_v25 = vpop.f32.mrb[1].mxu0 }
  0xe3   :  { %v113_v26 = vmax.f32 %v110_v24, 0.0 }
  0xe5   :  { %347 = vmatmul.mubr.msk.f32.vlgmr.msra.gmra.mrb[0].mxu1 %vm129_vm2, %v113_v26 }
 0x1b8   :  { %v199_v31 = vpop.f32.mrb[0].mxu1 }
 0x1b9   :  { %v200_v32 = vadd.f32 %v295_v30, %v199_v31  ;;  %v348_v33 = vpop.f32.mrb[1].mxu1 }
 0x1bb   :  { %v203_v34 = vmax.f32 %v200_v32, 0.0 }
 0x1bd   :  { %354 = vmatmul.mubr.msk.f32.vlgmr.msra.gmra.mrb[2].mxu0 %vm213_vm3, %v203_v34 }
 0x290   :  { %v283_v36 = vpop.f32.mrb[2].mxu0 }
 0x291   :  { %v284_v37 = vadd.f32 %v297_v35, %v283_v36  ;;  %v355_v38 = vpop.f32.mrb[3].mxu0 }
 0x293   :  { %288 = vst.msk [vmem:[%s493_s7] sm:$0xff] %vm287_vm4, %v284_v37 }

</bundles_post_ra>
